<compile_context>
chip_gen: v7x
topology: tpu7x:2x2x1
jax: 0.10.0
libtpu: 0.0.40
codegen_flags: <defaults>
</compile_context>

<pallas_src>
import functools

import jax
import jax.numpy as jnp
from jax.experimental import pallas as pl
from jax.experimental.pallas import tpu as pltpu


def _round_up(x, m):
    return (x + m - 1) // m * m


def _attn_gated_kernel(x_ref, wab_ref, bab_ref, wc_ref, bc_ref, out_ref, *,
                       d, reduce_out):
    x = x_ref[...]

    # Fused gate projection: one MXU pass produces both pre-activations.
    h = jnp.dot(x, wab_ref[...], preferred_element_type=jnp.float32)
    h = h + bab_ref[...]                       # bias broadcast over sublanes

    a = jnp.tanh(h[:, :d])                     # attention_a (EUP)
    b = jax.nn.sigmoid(h[:, d:])               # attention_b (EUP)
    gated = a * b                              # VPU

    if reduce_out:
        # n_classes == 1: VPU multiply + lane reduction instead of a matvec
        # on the MXU.  wc_ref is the transposed weight row, shape (1, D).
        out = jnp.sum(gated * wc_ref[...], axis=-1, keepdims=True)
        out = out + bc_ref[...]
    else:
        # General case: small (D, n_classes) matmul on the MXU.
        out = jnp.dot(gated, wc_ref[...], preferred_element_type=jnp.float32)
        out = out + bc_ref[...]

    out_ref[...] = out.astype(out_ref.dtype)


@functools.partial(jax.jit, static_argnames=("return_x", "block_n", "use_bf16"))
def attn_net_gated(x, params, return_x=False, block_n=512, use_bf16=False):
    """x: (N, L). params: dict of pre-transposed weights / (1, F) biases."""
    N, L = x.shape
    D = params["wa"].shape[1]
    n_classes = params["wc"].shape[1]

    # ---- wrapper-side packing (cheap XLA ops on tiny weight arrays) --------
    wab = jnp.concatenate([params["wa"], params["wb"]], axis=1)   # (L, 2D)
    bab = jnp.concatenate([params["ba"], params["bb"]],
                          axis=1).astype(jnp.float32)             # (1, 2D)

    reduce_out = (n_classes == 1)
    if reduce_out:
        wc = params["wc"].T.astype(jnp.float32)                   # (1, D)
    else:
        wc = params["wc"].astype(jnp.float32)                     # (D, n_classes)
    bc = params["bc"].astype(jnp.float32)                         # (1, n_classes)

    xk = x
    if use_bf16:
        xk = xk.astype(jnp.bfloat16)
        wab = wab.astype(jnp.bfloat16)

    # ---- tiling over N -----------------------------------------------------
    tile_n = min(block_n, _round_up(N, 8))
    n_pad = _round_up(N, tile_n)
    if n_pad != N:
        xk = jnp.pad(xk, ((0, n_pad - N), (0, 0)))
    grid = (n_pad // tile_n,)

    # ---- explicit VMEM budget (sized for v7x's 64 MiB as the tightest gen) --
    x_item = jnp.dtype(xk.dtype).itemsize
    w_item = jnp.dtype(wab.dtype).itemsize
    est = (2 * tile_n * L * x_item                # x double buffer
           + 2 * tile_n * n_classes * 4           # out double buffer
           + 2 * (L * 2 * D * w_item + 2 * D * 4  # resident weights/biases
                  + wc.size * 4 + n_classes * 4)
           + 4 * tile_n * 2 * D * 4)              # live f32 intermediates
    vmem_limit = int(min(max(4 * est, 16 * 2**20), 100 * 2**20))

    kernel = functools.partial(_attn_gated_kernel, d=D, reduce_out=reduce_out)

    out_padded = pl.pallas_call(
        kernel,
        out_shape=jax.ShapeDtypeStruct((n_pad, n_classes), jnp.float32),
        grid_spec=pltpu.PrefetchScalarGridSpec(
            num_scalar_prefetch=0,
            grid=grid,
            in_specs=[
                pl.BlockSpec((tile_n, L), lambda i: (i, 0)),    # x (streamed)
                pl.BlockSpec((L, 2 * D), lambda i: (0, 0)),     # fused Wab (resident)
                pl.BlockSpec((1, 2 * D), lambda i: (0, 0)),     # fused bias
                pl.BlockSpec(wc.shape, lambda i: (0, 0)),       # Wc (layout per path)
                pl.BlockSpec((1, n_classes), lambda i: (0, 0)), # bc
            ],
            out_specs=pl.BlockSpec((tile_n, n_classes), lambda i: (i, 0)),
        ),
        compiler_params=pltpu.CompilerParams(
            dimension_semantics=("parallel",),
            vmem_limit_bytes=vmem_limit,
        ),
    )(xk, wab, bab, wc, bc)

    A = out_padded[:N] if n_pad != N else out_padded
    if return_x:
        return A, x
    return A


def init_params(key, L, D, n_classes, dtype=jnp.float32):
    """torch.nn.Linear-style init (uniform +/- 1/sqrt(fan_in)).

    Weights are stored transposed: (in_features, out_features).
    """
    ks = jax.random.split(key, 6)
    bnd_L = 1.0 / jnp.sqrt(jnp.float32(L))
    bnd_D = 1.0 / jnp.sqrt(jnp.float32(D))
    return {
        "wa": jax.random.uniform(ks[0], (L, D), dtype, -bnd_L, bnd_L),
        "ba": jax.random.uniform(ks[1], (1, D), dtype, -bnd_L, bnd_L),
        "wb": jax.random.uniform(ks[2], (L, D), dtype, -bnd_L, bnd_L),
        "bb": jax.random.uniform(ks[3], (1, D), dtype, -bnd_L, bnd_L),
        "wc": jax.random.uniform(ks[4], (D, n_classes), dtype, -bnd_D, bnd_D),
        "bc": jax.random.uniform(ks[5], (1, n_classes), dtype, -bnd_D, bnd_D),
    }


def _reference(x, p):
    a = jnp.tanh(x @ p["wa"] + p["ba"])
    b = jax.nn.sigmoid(x @ p["wb"] + p["bb"])
    return (a * b) @ p["wc"] + p["bc"]


if __name__ == "__main__":
    key = jax.random.PRNGKey(0)

    # --- case 1: n_classes == 1 (reduction path), N multiple of 8 ----------
    N, L, D, n_classes = 8, 32, 16, 1
    kx, kp, key = jax.random.split(key, 3)
    x = jax.random.normal(kx, (N, L), dtype=jnp.float32)
    params = init_params(kp, L, D, n_classes)

    A = jax.block_until_ready(attn_net_gated(x, params))
    ref = _reference(x, params)
    assert A.shape == (N, n_classes)
    assert jnp.allclose(A, ref, atol=1e-5, rtol=1e-5)

    # return_x glue path
    A2, x_back = attn_net_gated(x, params, return_x=True)
    A2 = jax.block_until_ready(A2)
    assert jnp.allclose(A2, ref, atol=1e-5, rtol=1e-5)
    assert jnp.allclose(x_back, x)

    # bf16 input/weight path (f32 accumulation) — loose tolerance.
    A_bf16 = jax.block_until_ready(attn_net_gated(x, params, use_bf16=True))
    assert jnp.allclose(A_bf16, ref, atol=3e-2, rtol=3e-2)

    # --- case 2: n_classes > 1 (matmul path), N not divisible by tile ------
    N2, n_classes2 = 10, 4
    kx2, kp2, key = jax.random.split(key, 3)
    x2 = jax.random.normal(kx2, (N2, L), dtype=jnp.float32)
    params2 = init_params(kp2, L, D, n_classes2)

    A3 = jax.block_until_ready(attn_net_gated(x2, params2))
    ref2 = _reference(x2, params2)
    assert A3.shape == (N2, n_classes2)
    assert jnp.allclose(A3, ref2, atol=1e-5, rtol=1e-5)

    # TODO(synk): dropout(p=0.25) branch of __init__ is not exercised
    # (dropout=False default); would need pltpu.prng_* inside the kernel.

    print("KERNEL_OK")
</pallas_src>

<mosaic_0001>
module attributes {stable_mosaic.version = 11 : i64} {
  func.func @_attn_gated_kernel(%arg0: i32, %arg1: memref<8x32xf32, #tpu.memory_space<vmem>>, %arg2: memref<32x32xf32, #tpu.memory_space<vmem>>, %arg3: memref<1x32xf32, #tpu.memory_space<vmem>>, %arg4: memref<1x16xf32, #tpu.memory_space<vmem>>, %arg5: memref<1x1xf32, #tpu.memory_space<vmem>>, %arg6: memref<8x1xf32, #tpu.memory_space<vmem>>) attributes {dimension_semantics = [#tpu.dimension_semantics<parallel>], iteration_bounds = array<i64: 1>, scalar_prefetch = 0 : i64, scratch_operands = 0 : i64, tpu.core_type = #tpu.core_type<tc>, window_params = [{transform_indices = @transform_0, window_bounds = array<i64: 8, 32>}, {pipeline_mode = #tpu.pipeline_mode<synchronous>, transform_indices = @transform_1, window_bounds = array<i64: 32, 32>}, {pipeline_mode = #tpu.pipeline_mode<synchronous>, transform_indices = @transform_2, window_bounds = array<i64: 1, 32>}, {pipeline_mode = #tpu.pipeline_mode<synchronous>, transform_indices = @transform_3, window_bounds = array<i64: 1, 16>}, {pipeline_mode = #tpu.pipeline_mode<synchronous>, transform_indices = @transform_4, window_bounds = array<i64: 1, 1>}, {transform_indices = @transform_5, window_bounds = array<i64: 8, 1>}]} {
    %c0 = arith.constant 0 : index
    %c0_0 = arith.constant 0 : index
    %0 = vector.load %arg1[%c0, %c0_0] : memref<8x32xf32, #tpu.memory_space<vmem>>, vector<8x32xf32>
    %c0_1 = arith.constant 0 : index
    %c0_2 = arith.constant 0 : index
    %1 = vector.load %arg2[%c0_1, %c0_2] : memref<32x32xf32, #tpu.memory_space<vmem>>, vector<32x32xf32>
    %cst = arith.constant dense<0.000000e+00> : vector<8x32xf32>
    %2 = tpu.matmul %0, %1, %cst {dimension_numbers = #tpu.dot_dimension_numbers<[1], [0], [0], [1], [0, 0, 1, 1], [], []>} : vector<8x32xf32>, vector<32x32xf32>, vector<8x32xf32> -> vector<8x32xf32>
    %c0_3 = arith.constant 0 : index
    %c0_4 = arith.constant 0 : index
    %3 = vector.load %arg3[%c0_3, %c0_4] : memref<1x32xf32, #tpu.memory_space<vmem>>, vector<1x32xf32>
    %4 = vector.broadcast %3 : vector<1x32xf32> to vector<8x32xf32>
    %5 = arith.addf %2, %4 : vector<8x32xf32>
    %6 = vector.extract_strided_slice %5 {offsets = [0, 0], sizes = [8, 16], strides = [1, 1]} : vector<8x32xf32> to vector<8x16xf32>
    %7 = math.tanh %6 : vector<8x16xf32>
    %8 = vector.extract_strided_slice %5 {offsets = [0, 16], sizes = [8, 16], strides = [1, 1]} : vector<8x32xf32> to vector<8x16xf32>
    %9 = arith.negf %8 : vector<8x16xf32>
    %10 = math.exp %9 : vector<8x16xf32>
    %cst_5 = arith.constant 1.000000e+00 : f32
    %11 = vector.broadcast %cst_5 : f32 to vector<8x16xf32>
    %12 = arith.addf %11, %10 : vector<8x16xf32>
    %13 = arith.divf %11, %12 : vector<8x16xf32>
    %14 = arith.mulf %7, %13 : vector<8x16xf32>
    %c0_6 = arith.constant 0 : index
    %c0_7 = arith.constant 0 : index
    %15 = vector.load %arg4[%c0_6, %c0_7] : memref<1x16xf32, #tpu.memory_space<vmem>>, vector<1x16xf32>
    %16 = vector.broadcast %15 : vector<1x16xf32> to vector<8x16xf32>
    %17 = arith.mulf %14, %16 : vector<8x16xf32>
    %cst_8 = arith.constant dense<0.000000e+00> : vector<8xf32>
    %18 = vector.multi_reduction <add>, %17, %cst_8 [1] : vector<8x16xf32> to vector<8xf32>
    %19 = vector.shape_cast %18 : vector<8xf32> to vector<8x1xf32>
    %c0_9 = arith.constant 0 : index
    %c0_10 = arith.constant 0 : index
    %20 = vector.load %arg5[%c0_9, %c0_10] : memref<1x1xf32, #tpu.memory_space<vmem>>, vector<1x1xf32>
    %21 = vector.broadcast %20 : vector<1x1xf32> to vector<8x1xf32>
    %22 = arith.addf %19, %21 : vector<8x1xf32>
    %c0_11 = arith.constant 0 : index
    %c0_12 = arith.constant 0 : index
    %23 = vector.load %arg6[%c0_11, %c0_12] : memref<8x1xf32, #tpu.memory_space<vmem>>, vector<8x1xf32>
    tpu.vector_store %arg6[%c0_11, %c0_12], %22 {strides = array<i32>} : memref<8x1xf32, #tpu.memory_space<vmem>>, vector<8x1xf32>,
    return
  }
  func.func @transform_0(%arg0: i32) -> (i32, i32) {
    %c0_i32 = arith.constant 0 : i32
    %c0_i32_0 = arith.constant 0 : i32
    return %arg0, %c0_i32 : i32, i32
  }
  func.func @transform_1(%arg0: i32) -> (i32, i32) {
    %c0_i32 = arith.constant 0 : i32
    %c0_i32_0 = arith.constant 0 : i32
    %c0_i32_1 = arith.constant 0 : i32
    return %c0_i32, %c0_i32_0 : i32, i32
  }
  func.func @transform_2(%arg0: i32) -> (i32, i32) {
    %c0_i32 = arith.constant 0 : i32
    %c0_i32_0 = arith.constant 0 : i32
    %c0_i32_1 = arith.constant 0 : i32
    return %c0_i32, %c0_i32_0 : i32, i32
  }
  func.func @transform_3(%arg0: i32) -> (i32, i32) {
    %c0_i32 = arith.constant 0 : i32
    %c0_i32_0 = arith.constant 0 : i32
    %c0_i32_1 = arith.constant 0 : i32
    return %c0_i32, %c0_i32_0 : i32, i32
  }
  func.func @transform_4(%arg0: i32) -> (i32, i32) {
    %c0_i32 = arith.constant 0 : i32
    %c0_i32_0 = arith.constant 0 : i32
    %c0_i32_1 = arith.constant 0 : i32
    return %c0_i32, %c0_i32_0 : i32, i32
  }
  func.func @transform_5(%arg0: i32) -> (i32, i32) {
    %c0_i32 = arith.constant 0 : i32
    %c0_i32_0 = arith.constant 0 : i32
    return %arg0, %c0_i32 : i32, i32
  }
}

</mosaic_0001>

<bundles_post_ra>
// kernel: attn_net_gated.1
= control target key start
LH: loop header
LB: loop body
LE: loop exit
PB: predicated region body
PF: predicated region fallthrough
CT: control target
= control target key end

     0   :  { %v183_v0 = vmov 0.0|0.0   ;;  %vm184_vm0 = vmmov 0   ;;  %v185_v4 = vmov 0.0   ;;  %vm34_vm1 = vcmask 261120   ;;  %s244_s1 = inlined_call_operand.vmem [shape: f32[32,32], index: 1, kind: input, shape index: {}]   ;;  %s245_s0 = inlined_call_operand.vmem [shape: f32[8,32], index: 0, kind: input, shape index: {}]   ;;  %s246_s2 = inlined_call_operand.vmem [shape: f32[1,32], index: 2, kind: input, shape index: {}]   ;;  %s247_s4 = inlined_call_operand.<no memory space> [shape: f32[1,1], index: 4, kind: input, shape index: {}]   ;;  %s248_s3 = inlined_call_operand.vmem [shape: f32[1,16], index: 3, kind: input, shape index: {}]   ;;  %s249_s5 = inlined_call_operand.vmem [shape: f32[8,1], index: 5, kind: output, shape index: {}]  }
   0x1   :  { %167 = vmatprep.subr.bf16.mxu0 %v183_v0  ;;  %v23_v1 = vld [vmem:[%s244_s1] sm:$0xff]  ;;  %v24_v2 = vld [vmem:[%s244_s1 + $0x8] sm:$0xff]  ;;  %v25_v3 = vld [vmem:[%s244_s1 + $0x10] sm:$0xff]  ;;  %164 = vmatprep.mubr.msk.f32.mxu0 %vm184_vm0, %v185_v4  ;;  %v10_v16 = vstv %s247_s4  ;;  %vm128_vm2 = vcmask 130048   ;;  %vm140_vm3 = vcmask 7168  }
   0x2   :  { %v168_v5 = vpack.c.bf16 %v24_v2, %v23_v1  ;;  %v26_v6 = vld [vmem:[%s244_s1 + $0x18] sm:$0xff]  ;;  %v22_v8 = vld [vmem:[%s245_s0] sm:$0xff]  ;;  %11 = vst [vmem:[#allocation2] sm:$0x1] %v10_v16  ;;  %s186_s0 = smov 112  }
   0x3   :  { %v171_v7 = vpack.c.bf16 %v26_v6, %v25_v3  ;;  %v146_v9 = vld [vmem:[%s246_s2] ss:$0 sm:$0xff] }
   0x4   :  { %169 = vmatpush3.bf16.msra.mxu0 %v168_v5  ;;  %v149_v20 = vld [vmem:[%s248_s3] ss:$0 sm:$0xff] }
   0x5   :  { %170 = vmatprep.subr.bf16.mxu0 %v183_v0 }
   0x8   :  { %172 = vmatpush3.bf16.msra.mxu0 %v171_v7 }
   0x9   :  { %v150_v24 = vld [vmem:[#allocation2] ss:$0 sm:$0xff] }
   0xb   :  { %165 = vmatmul.mubr.msk.f32.vlgmr.msra.gmra.mrb[0].mxu0 %vm34_vm1, %v22_v8 }
  0xde   :  { %v104_v10 = vpop.f32.mrb[0].mxu0 }
  0xdf   :  { %v105_v11 = vadd.f32 %v146_v9, %v104_v10  ;;  %v166_v12 = vpop.f32.mrb[1].mxu0 }
  0xe1   :  { %v148_v13 = vmul.f32 -1.442695, %v105_v11 }
  0xe3   :  { %177 = vpow2.f32 %v148_v13 }
  0xed   :  { %v178_v14 = vpop.eup %177 }
  0xee   :  { %v112_v15 = vadd.f32 1.0, %v178_v14 }
  0xf0   :  { %179 = vrcp.f32 %v112_v15 }
  0xf1   :  { %181 = vtanh.f32 %v105_v11 }
  0xfa   :  { %v180_v17 = vpop.eup %179 }
  0xfb   :  { %116 = vrot.lane.b32.xlu0 %v180_v17, %s186_s0  ;;  %v182_v18 = vpop.eup %181 }
 0x16d   :  { %v117_v19 = vpop.permute.xlu0 %116 }
 0x16e   :  { %v119_v21 = vmul.f32 %v182_v18, %v117_v19 }
 0x170   :  { %v127_v22 = vmul.f32 %v149_v20, %v119_v21 }
 0x172   :  { %v129_v23 = vsel %vm128_vm2, %v127_v22, 0.0 }
 0x173   :  { %130 = vadd.xlane.f32.xlu0 %v129_v23 }
 0x200   :  { %v131_v25 = vpop.xlane.xlu0 %130 }
 0x201   :  { %v139_v26 = vadd.f32 %v150_v24, %v131_v25 }
 0x203   :  { %141 = vst.msk [vmem:[%s249_s5] sm:$0xff] %vm140_vm3, %v139_v26 }

</bundles_post_ra>
